<compile_context>
chip_gen: v7x
topology: tpu7x:2x2x1
jax: 0.10.0
libtpu: 0.0.40
codegen_flags: <defaults>
</compile_context>

<pallas_src>
import math

import jax
import jax.numpy as jnp
from jax.experimental import pallas as pl
from jax.experimental.pallas import tpu as pltpu


_SMALL_SLAB_BYTES = 1 << 20     # below this per-batch [L, D] slab -> batch-blocked path
_TARGET_TILE_BYTES = 4 << 20    # ~4 MiB blocks
_VMEM_LIMIT_BYTES = 32 << 20    # covers 3 refs x 2 buffers x 4 MiB; safe on v5e/v6e/v7x


def _round_up(n: int, m: int) -> int:
    return ((n + m - 1) // m) * m


def _sublane(dtype) -> int:
    # Sublane packing: 8 rows for 32-bit, 16 for bf16/f16, 32 for int8/fp8.
    return max(8, 32 // jnp.dtype(dtype).itemsize)


def _build_pe(embedding_dim: int = 512, max_len: int = 5000,
              dtype=jnp.float32) -> jnp.ndarray:
    """Positional-encoding buffer, identical to the torch init (even D only).

    Built once at module init, already in the model dtype (note: for bf16 this
    rounds pe before the add, vs torch promoting to f32 — ~1 ulp difference).
    Rows are padded up to a multiple of 8 so kernel blocks stay sublane-aligned.
    """
    assert embedding_dim % 2 == 0, "PositionalEncoding requires an even embedding_dim"
    max_len_pad = _round_up(max_len, 8)
    position = jnp.arange(0, max_len_pad, dtype=jnp.float32)[:, None]       # [Lmax, 1]
    div_term = jnp.exp(
        jnp.arange(0, embedding_dim, 2, dtype=jnp.float32)
        * (-math.log(10000.0) / embedding_dim)
    )                                                                        # [D/2]
    angles = position * div_term                                             # [Lmax, D/2]
    pe = jnp.zeros((max_len_pad, embedding_dim), dtype=jnp.float32)
    pe = pe.at[:, 0::2].set(jnp.sin(angles))
    pe = pe.at[:, 1::2].set(jnp.cos(angles))
    return pe.astype(dtype)                                                  # [Lmax, D]


def _pos_enc_kernel(x_ref, pe_ref, o_ref):
    # Seq-tiled path: x_ref / pe_ref / o_ref are [TL, D] (batch squeezed) -> plain vadd.
    o_ref[...] = (x_ref[...] + pe_ref[...]).astype(o_ref.dtype)


def _pos_enc_bcast_kernel(x_ref, pe_ref, o_ref):
    # Batch-blocked path: x_ref/o_ref [TB, L, D]; pe_ref [round_up(L,8), D].
    L = x_ref.shape[1]
    pe = pe_ref[0:L, :]                       # static slice; drops sublane padding rows
    o_ref[...] = (x_ref[...] + pe[None, :, :]).astype(o_ref.dtype)


def _choose_seq_tile(L: int, D: int, dtype) -> int:
    """Pick TL (multiple of the sublane packing, <=1024) so one [TL, D] block is ~4 MiB."""
    itemsize = jnp.dtype(dtype).itemsize
    sub = _sublane(dtype)
    tl = _TARGET_TILE_BYTES // max(1, D * itemsize)
    tl = max(sub, min(1024, (tl // sub) * sub))
    return min(tl, _round_up(L, sub))         # never bigger than the (rounded) sequence


def positional_encoding(x: jnp.ndarray, pe: jnp.ndarray, *, donate_x: bool = False) -> jnp.ndarray:
    """out = x + pe[:L]  with x: [B, L, D] and pe: [max_len_pad, D] (built at init)."""
    B, L, D = x.shape
    assert pe.shape[0] >= L and pe.shape[1] == D, "pe buffer too small for this input"
    if pe.dtype != x.dtype:
        # Fallback only — prefer building pe in the model dtype at init.
        pe = pe.astype(x.dtype)

    itemsize = jnp.dtype(x.dtype).itemsize
    cost = pl.CostEstimate(
        flops=B * L * D,
        transcendentals=0,
        bytes_accessed=(2 * B * L * D + L * D) * itemsize,
    )
    io_alias = {0: 0} if donate_x else {}
    cparams = lambda sem: pltpu.CompilerParams(
        dimension_semantics=sem, vmem_limit_bytes=_VMEM_LIMIT_BYTES)

    slab_bytes = L * D * itemsize
    if slab_bytes < _SMALL_SLAB_BYTES:
        # Small-L regime: fatten grid steps by blocking over batch; pe block index
        # is constant -> DMA'd once.
        tb = int(max(1, min(B, _TARGET_TILE_BYTES // max(1, slab_bytes))))
        lp8 = _round_up(L, 8)
        return pl.pallas_call(
            _pos_enc_bcast_kernel,
            out_shape=jax.ShapeDtypeStruct((B, L, D), x.dtype),
            grid_spec=pltpu.PrefetchScalarGridSpec(
                num_scalar_prefetch=0,
                grid=(pl.cdiv(B, tb),),
                in_specs=[
                    pl.BlockSpec((tb, L, D), lambda b: (b, 0, 0)),   # x tile
                    pl.BlockSpec((lp8, D), lambda b: (0, 0)),        # pe (constant block)
                ],
                out_specs=pl.BlockSpec((tb, L, D), lambda b: (b, 0, 0)),
            ),
            compiler_params=cparams(("parallel",)),
            cost_estimate=cost,
            input_output_aliases=io_alias,
        )(x, pe)

    # Long-sequence regime: tile the sequence, batch innermost (pe DMA skipped
    # across the B inner steps). Final L-tile may be partial: OOB writes are
    # dropped and the garbage tail reads are harmless for an elementwise add.
    tl = _choose_seq_tile(L, D, x.dtype)
    return pl.pallas_call(
        _pos_enc_kernel,
        out_shape=jax.ShapeDtypeStruct((B, L, D), x.dtype),
        grid_spec=pltpu.PrefetchScalarGridSpec(
            num_scalar_prefetch=0,
            grid=(pl.cdiv(L, tl), B),
            in_specs=[
                pl.BlockSpec((pl.Squeezed(), tl, D), lambda l, b: (b, l, 0)),  # x tile
                pl.BlockSpec((tl, D), lambda l, b: (l, 0)),                    # pe tile
            ],
            out_specs=pl.BlockSpec((pl.Squeezed(), tl, D), lambda l, b: (b, l, 0)),
        ),
        compiler_params=cparams(("parallel", "parallel")),
        cost_estimate=cost,
        input_output_aliases=io_alias,
    )(x, pe)
    # TODO(synk): for very narrow D (<128) a wrapper-side fold of L*D into the
    # lane axis would avoid masked partial stores; skipped since production D>=128.


if __name__ == "__main__":
    key = jax.random.PRNGKey(0)
    k1, k2 = jax.random.split(key)

    # --- Small-shape test (exercises the batch-blocked small-L path) ---
    B, L, D = 2, 8, 32
    MAX_LEN = 64
    x = jax.random.normal(k1, (B, L, D), dtype=jnp.float32)
    pe = _build_pe(embedding_dim=D, max_len=MAX_LEN, dtype=jnp.float32)

    out = jax.block_until_ready(positional_encoding(x, pe))
    ref = x + pe[None, :L, :]
    assert out.shape == (B, L, D)
    assert jnp.allclose(out, ref, atol=1e-6), "mismatch vs reference (small path)"

    # --- Ragged-sequence test (exercises the seq-tiled path with a partial final tile) ---
    B2, L2, D2 = 2, 1300, 512           # L2 % tl != 0  ->  partial last block
    MAX_LEN2 = 2048
    x2 = jax.random.normal(k2, (B2, L2, D2), dtype=jnp.float32)
    pe2 = _build_pe(embedding_dim=D2, max_len=MAX_LEN2, dtype=jnp.float32)

    out2 = jax.block_until_ready(positional_encoding(x2, pe2))
    ref2 = x2 + pe2[None, :L2, :]
    assert out2.shape == (B2, L2, D2)
    assert jnp.allclose(out2, ref2, atol=1e-6), "mismatch vs reference (ragged seq path)"

    print("KERNEL_OK")
</pallas_src>

<mosaic_0001>
module attributes {stable_mosaic.version = 11 : i64} {
  func.func @_pos_enc_bcast_kernel(%arg0: i32, %arg1: memref<2x8x32xf32, #tpu.memory_space<vmem>>, %arg2: memref<8x32xf32, #tpu.memory_space<vmem>>, %arg3: memref<2x8x32xf32, #tpu.memory_space<vmem>>) attributes {dimension_semantics = [#tpu.dimension_semantics<parallel>], iteration_bounds = array<i64: 1>, scalar_prefetch = 0 : i64, scratch_operands = 0 : i64, tpu.core_type = #tpu.core_type<tc>, window_params = [{transform_indices = @transform_0, window_bounds = array<i64: 2, 8, 32>}, {transform_indices = @transform_1, window_bounds = array<i64: 8, 32>}, {transform_indices = @transform_2, window_bounds = array<i64: 2, 8, 32>}]} {
    %c0 = arith.constant 0 : index
    %c0_0 = arith.constant 0 : index
    %0 = vector.load %arg2[%c0, %c0_0] : memref<8x32xf32, #tpu.memory_space<vmem>>, vector<8x32xf32>
    %c0_1 = arith.constant 0 : index
    %c0_2 = arith.constant 0 : index
    %c0_3 = arith.constant 0 : index
    %1 = vector.load %arg1[%c0_1, %c0_2, %c0_3] : memref<2x8x32xf32, #tpu.memory_space<vmem>>, vector<2x8x32xf32>
    %2 = vector.shape_cast %0 : vector<8x32xf32> to vector<1x8x32xf32>
    %3 = vector.broadcast %2 : vector<1x8x32xf32> to vector<2x8x32xf32>
    %4 = arith.addf %1, %3 : vector<2x8x32xf32>
    %c0_4 = arith.constant 0 : index
    %c0_5 = arith.constant 0 : index
    %c0_6 = arith.constant 0 : index
    %5 = vector.load %arg3[%c0_4, %c0_5, %c0_6] : memref<2x8x32xf32, #tpu.memory_space<vmem>>, vector<2x8x32xf32>
    tpu.vector_store %arg3[%c0_4, %c0_5, %c0_6], %4 {strides = array<i32>} : memref<2x8x32xf32, #tpu.memory_space<vmem>>, vector<2x8x32xf32>,
    return
  }
  func.func @transform_0(%arg0: i32) -> (i32, i32, i32) {
    %c0_i32 = arith.constant 0 : i32
    %c0_i32_0 = arith.constant 0 : i32
    %c0_i32_1 = arith.constant 0 : i32
    return %arg0, %c0_i32, %c0_i32_0 : i32, i32, i32
  }
  func.func @transform_1(%arg0: i32) -> (i32, i32) {
    %c0_i32 = arith.constant 0 : i32
    %c0_i32_0 = arith.constant 0 : i32
    %c0_i32_1 = arith.constant 0 : i32
    return %c0_i32, %c0_i32_0 : i32, i32
  }
  func.func @transform_2(%arg0: i32) -> (i32, i32, i32) {
    %c0_i32 = arith.constant 0 : i32
    %c0_i32_0 = arith.constant 0 : i32
    %c0_i32_1 = arith.constant 0 : i32
    return %arg0, %c0_i32, %c0_i32_0 : i32, i32, i32
  }
}

</mosaic_0001>

<bundles_post_ra>
// kernel: tpu_custom_call.1
= control target key start
LH: loop header
LB: loop body
LE: loop exit
PB: predicated region body
PF: predicated region fallthrough
CT: control target
= control target key end

     0   :  { %vm17_vm0 = vcmask 261120   ;;  %s102_s0 = inlined_call_operand.vmem [shape: f32[2,8,32], index: 0, kind: input, shape index: {}]   ;;  %s103_s1 = inlined_call_operand.vmem [shape: f32[64,32], index: 1, kind: input, shape index: {}]   ;;  %s104_s2 = inlined_call_operand.hbm [shape: f32[2,8,32], index: 2, kind: output, shape index: {}]  }
   0x1   :  { %v12_v0 = vld [vmem:[%s103_s1] sm:$0xff]  ;;  %v14_v2 = vld [vmem:[%s102_s0 + $0x8] sm:$0xff] }
   0x2   :  { %v13_v1 = vld [vmem:[%s102_s0] sm:$0xff]  ;;  %v16_v4 = vadd.f32 %v14_v2, %v12_v0 }
   0x3   :  { %v15_v3 = vadd.f32 %v13_v1, %v12_v0 }
   0x4   :  { %7 = vsyncpa [#allocation3], 0  ;;  %s63_s15 = smov [#allocation2]   ;;  %19 = vst.msk [vmem:[#allocation2 + $0x8] sm:$0xff] %vm17_vm0, %v16_v4 }
   0x5   :  { %s25_s16 = sshll.u32 %s63_s15, 4  ;;  %18 = vst.msk [vmem:[#allocation2] sm:$0xff] %vm17_vm0, %v15_v3  ;;  %s26_s16 = int_to_ptr.vmem [resolvable:$true] %s25_s16 }
   0x6   :  { %s39_s17 = scalar_lea.vmem %s26_s16, 256  ;;  %p44_p1 = scmp.lt.s32.totalorder %s26_s16, %s26_s16 }
   0x7   :  { %p40_p0 = scmp.ne.s32.totalorder %s26_s16, %s39_s17  ;;  %p45_p2 = scmp.lt.s32.totalorder %s39_s17, %s39_s17 }
   0x9   :  { %p46_p3 = por %p45_p2, %p44_p1 }
   0xb   :  { %p47_p4 = pnand %p46_p3, %p40_p0 }
   0xd   :  { %50 = shalt.err (!%p47_p4)
}
   0xe   :  { %s51_s19 = scalar_lea.hbm %s104_s2, 256 }
   0xf   :  { %p52_p5 = scmp.ne.s32.totalorder %s104_s2, %s51_s19  ;;  %p55_p6 = scmp.lt.u32.totalorder %s51_s19, %s104_s2 }
  0x11   :  { %p57_p7 = pnand %p55_p6, %p52_p5 }
  0x13   :  { %60 = shalt.err (!%p57_p7)
}
  0x14   :  { %s64_s23 = smov 128   ;;  %s65_s24 = smov 8  }
  0x15   :  { %31 = dma.vmem_to_hbm [thread:$0]  %s26_s16, 256, %s104_s2, [#allocation3], %s64_s23, %s64_s23, %s65_s24  }
  0x16   :  { %61 = dma.done.wait [#allocation3], 256  }
  0x17   :  { %62 = vsyncadd [#allocation3], 4294967040 }
  0x18   :  { %35 = vsyncpa [#allocation3], 1 }

</bundles_post_ra>
